<compile_context>
chip_gen: v7x
topology: tpu7x:2x2x1
jax: 0.10.0
libtpu: 0.0.40
codegen_flags: <defaults>
</compile_context>

<pallas_src>
import functools

import jax
import jax.numpy as jnp
import numpy as np
from jax.experimental import pallas as pl
from jax.experimental.pallas import tpu as pltpu


_NORM_EPS = 1e-12   # F.normalize(p=2) eps
_COS_EPS = 1e-6     # torch.nn.CosineSimilarity eps


# ----------------------------------------------------------------------------
# VMEM-budget-aware tiling helpers
# ----------------------------------------------------------------------------

def _vmem_capacity_bytes():
    """Physical VMEM capacity of the local TPU (fallback: 64 MiB = v7x)."""
    try:
        info = pltpu.get_tpu_info()
        cap = int(getattr(info, "vmem_capacity_bytes", 0) or 0)
        if cap > 0:
            return cap
    except Exception:
        pass
    return 64 * 1024 * 1024


def _sublane(itemsize):
    # minimal legal second-minor tile: 8 rows f32, 16 rows bf16, 32 rows int8
    return 8 * max(1, 4 // max(1, int(itemsize)))


def _row_tile(n_rows, itemsize, per_row_bytes, resident_bytes, max_tile, cap):
    """Largest sublane-legal row tile that fits the VMEM budget alongside the
    grid-invariant resident bytes, capped at max_tile and the row count."""
    sub = _sublane(itemsize)
    budget = int(cap * 0.4) - int(resident_bytes)
    tr = max(sub, budget // max(1, per_row_bytes)) if budget > 0 else sub
    tr = min(tr, max_tile)
    tr = max(sub, (tr // sub) * sub)
    n_pad = ((n_rows + sub - 1) // sub) * sub
    return min(tr, max(sub, n_pad))


def _apply_tile_cap(tr, itemsize, row_tile_cap):
    if row_tile_cap is None:
        return tr
    sub = _sublane(itemsize)
    return min(tr, max(sub, (int(row_tile_cap) // sub) * sub))


def _compiler_params(sequential, cap):
    return pltpu.CompilerParams(
        dimension_semantics=("arbitrary",) if sequential else ("parallel",),
        vmem_limit_bytes=min(int(cap * 0.75), 100 * 1024 * 1024),
    )


# ----------------------------------------------------------------------------
# Pallas kernels
# ----------------------------------------------------------------------------

def _reduce_models_kernel(*refs, n_models, normalize, op, with_cossim,
                          target_idx, n_rows):
    """aggregate_mean / aggregate_sum over the M per-model input streams with
    the optional F.normalize and the cosine-similarity diagnostics fused in
    (single pass over the data, HBM-roofline bound)."""
    x_refs = refs[:n_models]
    o_ref = refs[n_models]
    cos_ref = refs[n_models + 1] if with_cossim else None

    tr = x_refs[0].shape[0]

    def load(m):
        xm = x_refs[m][...].astype(jnp.float32)
        if normalize:
            nrm = jnp.sqrt(jnp.sum(xm * xm, axis=-1, keepdims=True))
            xm = xm / jnp.maximum(nrm, _NORM_EPS)
        return xm

    a = None
    if with_cossim:
        step = pl.program_id(0)

        @pl.when(step == 0)
        def _():
            cos_ref[...] = jnp.zeros_like(cos_ref)

        # Tail-row mask: the partial last block reads undefined rows which
        # must not leak into the running cosine-similarity sum.
        row = step * tr + jax.lax.broadcasted_iota(jnp.int32, (tr, 1), 0)
        valid = row < n_rows
        lane = jax.lax.broadcasted_iota(jnp.int32, (1, n_models), 1)
        a = load(target_idx)
        a_nrm = jnp.sqrt(jnp.sum(a * a, axis=-1, keepdims=True))
        contrib = jnp.zeros((1, n_models), jnp.float32)

    acc = None
    for m in range(n_models):
        xm = a if (with_cossim and m == target_idx) else load(m)
        acc = xm if acc is None else acc + xm
        if with_cossim and m != target_idx:
            b_nrm = jnp.sqrt(jnp.sum(xm * xm, axis=-1, keepdims=True))
            cos = jnp.sum(a * xm, axis=-1, keepdims=True) / jnp.maximum(
                a_nrm * b_nrm, _COS_EPS)
            cos = jnp.where(valid, cos, 0.0)
            s = jnp.sum(cos, axis=0, keepdims=True)            # (1, 1)
            contrib = jnp.where(lane == m, contrib + s, contrib)

    if op == "mean":
        acc = acc * (1.0 / n_models)
    o_ref[...] = acc.astype(o_ref.dtype)

    if with_cossim:
        cos_ref[...] += contrib                                # resident output


def _attn_agg_kernel(*refs, n_models, query_idx, dh, normalize, with_cossim,
                     target_idx, n_rows, matmul_dtype):
    """AttentionBasedAggregator forward (mode='token2token',
    reuse_target_query_as_key=True, all projections enabled).

    One fused (tr,H)x(H,Dh+Do) key|value matmul per model (native dtype, f32
    accumulate), normalization folded into a post-matmul row scale, the
    query-model key matmul skipped (k == q), softmax over M per-model score
    columns, and the cosine-similarity diagnostics fused in."""
    x_refs = refs[:n_models]
    wkv_ref = refs[n_models]          # (M, H, Dh+Do)   wkv[q][:, :Dh] == wq
    bkv_ref = refs[n_models + 1]      # (M, 1, Dh+Do)
    o_ref = refs[n_models + 2]        # (tr, Do)
    cos_ref = refs[n_models + 3] if with_cossim else None

    tr = x_refs[0].shape[0]
    inv_sqrt_dh = 1.0 / float(np.sqrt(dh))

    # Load each model's tile ONCE; the MXU sees the native (or requested)
    # dtype, all norm / softmax math is f32.
    xs = [x_refs[m][...] for m in range(n_models)]
    if matmul_dtype is not None:
        lhs = [x.astype(matmul_dtype) for x in xs]
    else:
        lhs = xs

    sqs = None
    inv_norms = None
    if normalize or with_cossim:
        sqs = [jnp.sum(xs[m].astype(jnp.float32) ** 2, axis=-1, keepdims=True)
               for m in range(n_models)]
    if normalize:
        # F.normalize folded into a post-matmul scale:
        #   (x/||x||) @ W + b == (x @ W) * (1/max(||x||, eps)) + b
        inv_norms = [1.0 / jnp.maximum(jnp.sqrt(sq), _NORM_EPS) for sq in sqs]

    scores = [None] * n_models
    values = [None] * n_models
    q = None
    order = [query_idx] + [m for m in range(n_models) if m != query_idx]
    for m in order:
        kv = jnp.dot(lhs[m], wkv_ref[m], preferred_element_type=jnp.float32)
        if normalize:
            kv = kv * inv_norms[m]
        kv = kv + bkv_ref[m]                          # (tr, Dh+Do) f32
        k = kv[:, :dh]
        values[m] = kv[:, dh:]
        if m == query_idx:
            q = k                                     # wk[q]==wq, bk[q]==bq
            scores[m] = jnp.sum(q * q, axis=-1, keepdims=True) * inv_sqrt_dh
        else:
            scores[m] = jnp.sum(q * k, axis=-1, keepdims=True) * inv_sqrt_dh

    # softmax over the M (tr, 1) score columns (unrolled, no lane-M concat)
    s_max = scores[0]
    for m in range(1, n_models):
        s_max = jnp.maximum(s_max, scores[m])
    exps = [jnp.exp(s - s_max) for s in scores]
    denom = exps[0]
    for m in range(1, n_models):
        denom = denom + exps[m]
    inv_denom = pl.reciprocal(denom)    # exact: approx would drift attn weights

    acc = None
    for m in range(n_models):
        w = exps[m] * inv_denom                       # (tr, 1)
        acc = w * values[m] if acc is None else acc + w * values[m]
    o_ref[...] = acc.astype(o_ref.dtype)

    if with_cossim:
        step = pl.program_id(0)

        @pl.when(step == 0)
        def _():
            cos_ref[...] = jnp.zeros_like(cos_ref)

        row = step * tr + jax.lax.broadcasted_iota(jnp.int32, (tr, 1), 0)
        valid = row < n_rows
        lane = jax.lax.broadcasted_iota(jnp.int32, (1, n_models), 1)

        a32 = xs[target_idx].astype(jnp.float32)
        norms = [jnp.sqrt(sq) for sq in sqs]
        na_eff = (norms[target_idx] * inv_norms[target_idx] if normalize
                  else norms[target_idx])
        contrib = jnp.zeros((1, n_models), jnp.float32)
        for m in range(n_models):
            if m == target_idx:
                continue
            b32 = xs[m].astype(jnp.float32)
            dot_ab = jnp.sum(a32 * b32, axis=-1, keepdims=True)
            if normalize:
                dot_ab = dot_ab * inv_norms[target_idx] * inv_norms[m]
                nb_eff = norms[m] * inv_norms[m]
            else:
                nb_eff = norms[m]
            cos = dot_ab / jnp.maximum(na_eff * nb_eff, _COS_EPS)
            cos = jnp.where(valid, cos, 0.0)
            s = jnp.sum(cos, axis=0, keepdims=True)   # (1, 1)
            contrib = jnp.where(lane == m, contrib + s, contrib)
        cos_ref[...] += contrib                       # resident output


# ----------------------------------------------------------------------------
# Wrappers (pallas_call plumbing)
# ----------------------------------------------------------------------------

def aggregate_reduce_pallas(xs, *, op, normalize, cossim_target_idx=None,
                            row_tile_cap=None):
    """xs: list of M (N, H) per-model hidden states -> (N, H) mean/sum; plus
    (M,) f32 cossim-vs-target if requested (single fused pass over the data)."""
    n_models = len(xs)
    N, H = xs[0].shape
    dtype = xs[0].dtype
    itemsize = jnp.dtype(dtype).itemsize
    with_cossim = cossim_target_idx is not None

    cap = _vmem_capacity_bytes()
    # double-buffered x tiles + double-buffered output tile + f32 temporaries
    per_row = (2 * n_models + 2) * H * itemsize + 4 * H * 4
    tr = _row_tile(N, itemsize, per_row, 0, 512, cap)
    tr = _apply_tile_cap(tr, itemsize, row_tile_cap)

    kern = functools.partial(
        _reduce_models_kernel, n_models=n_models, normalize=normalize, op=op,
        with_cossim=with_cossim,
        target_idx=(cossim_target_idx if with_cossim else 0), n_rows=N)

    in_specs = [pl.BlockSpec((tr, H), lambda i: (i, 0)) for _ in range(n_models)]
    out_shape = [jax.ShapeDtypeStruct((N, H), dtype)]
    out_specs = [pl.BlockSpec((tr, H), lambda i: (i, 0))]
    if with_cossim:
        out_shape.append(jax.ShapeDtypeStruct((1, n_models), jnp.float32))
        out_specs.append(pl.BlockSpec((1, n_models), lambda i: (0, 0)))

    outs = pl.pallas_call(
        kern,
        out_shape=out_shape,
        grid=(pl.cdiv(N, tr),),
        in_specs=in_specs,
        out_specs=out_specs,
        compiler_params=_compiler_params(sequential=with_cossim, cap=cap),
    )(*xs)

    if with_cossim:
        return outs[0], outs[1][0] * (1.0 / N)
    return outs[0], None


def attention_aggregate_pallas(xs, params, *, query_idx, normalize,
                               cossim_target_idx=None, row_tile_cap=None,
                               matmul_dtype=None):
    """xs: list of M (N, H) per-model hidden states.  params: fused wkv
    (M, H, Dh+Do) and bkv (M, 1, Dh+Do).  Returns ((N, Do), optional (M,)
    cossim) in the input dtype."""
    n_models = len(xs)
    N, H = xs[0].shape
    dtype = xs[0].dtype
    itemsize = jnp.dtype(dtype).itemsize
    with_cossim = cossim_target_idx is not None

    wkv, bkv = params["wkv"], params["bkv"]
    dh, do = params["dh"], params["do"]
    dhv = dh + do
    if matmul_dtype is not None:
        wkv = wkv.astype(matmul_dtype)
    w_itemsize = jnp.dtype(wkv.dtype).itemsize

    cap = _vmem_capacity_bytes()
    # Grid-invariant weights/biases are budgeted at 2x (default double
    # buffering); pl.BlockSpec(..., pipeline_mode=pl.Buffered(1)) on those
    # specs would halve this if weight VMEM ever dominates.
    resident = 2 * (wkv.size * w_itemsize + bkv.size * 4)
    # double-buffered x tiles + output tile + f32 live values (held v_m, kv, q)
    per_row = (2 * n_models * H * itemsize + 2 * do * itemsize
               + 4 * (n_models * do + dhv + dh + 4 * n_models))
    tr = _row_tile(N, itemsize, per_row, resident, 256, cap)
    tr = _apply_tile_cap(tr, itemsize, row_tile_cap)

    kern = functools.partial(
        _attn_agg_kernel, n_models=n_models, query_idx=query_idx, dh=dh,
        normalize=normalize, with_cossim=with_cossim,
        target_idx=(cossim_target_idx if with_cossim else 0), n_rows=N,
        matmul_dtype=matmul_dtype)

    in_specs = [pl.BlockSpec((tr, H), lambda i: (i, 0)) for _ in range(n_models)]
    in_specs += [
        pl.BlockSpec(tuple(wkv.shape), lambda i: (0, 0, 0)),   # invariant wkv
        pl.BlockSpec(tuple(bkv.shape), lambda i: (0, 0, 0)),   # invariant bkv
    ]
    out_shape = [jax.ShapeDtypeStruct((N, do), dtype)]
    out_specs = [pl.BlockSpec((tr, do), lambda i: (i, 0))]
    if with_cossim:
        out_shape.append(jax.ShapeDtypeStruct((1, n_models), jnp.float32))
        out_specs.append(pl.BlockSpec((1, n_models), lambda i: (0, 0)))

    outs = pl.pallas_call(
        kern,
        out_shape=out_shape,
        grid=(pl.cdiv(N, tr),),
        in_specs=in_specs,
        out_specs=out_specs,
        compiler_params=_compiler_params(sequential=with_cossim, cap=cap),
    )(*xs, wkv, bkv)

    if with_cossim:
        return outs[0], outs[1][0] * (1.0 / N)
    return outs[0], None


# ----------------------------------------------------------------------------
# TransformerMultiModel (aggregation head) in JAX + Pallas
# ----------------------------------------------------------------------------

class TransformerMultiModelPallas:
    """Forward semantics of TransformerMultiModel given per-model hidden
    states (the transformer backbones themselves are external inputs)."""

    def __init__(self, model_ids, input_size, *, aggregate="attention",
                 agg_hidden_size=None, query_idx=0,
                 normalize_embeddings=False, cossim_target_embed_key=None,
                 matmul_dtype=None, row_tile_cap=None, key=None):
        self.model_ids = list(model_ids)
        self.n_models = len(self.model_ids)
        self.input_size = input_size
        self.aggregate_type = aggregate
        self.query_idx = query_idx
        self.normalize_embeddings = normalize_embeddings
        self.cossim_target_embed_key = cossim_target_embed_key
        self.matmul_dtype = matmul_dtype
        self.row_tile_cap = row_tile_cap

        self.params = None
        if aggregate == "attention":
            H = input_size
            Dh = agg_hidden_size or 128
            Do = input_size
            key = key if key is not None else jax.random.PRNGKey(0)
            ks = jax.random.split(key, 6)
            bound = 1.0 / np.sqrt(H)
            # torch.nn.Linear: W (out, in), y = x @ W^T + b  ->  store (in, out)
            wq = jax.random.uniform(ks[0], (H, Dh), jnp.float32, -bound, bound)
            bq = jax.random.uniform(ks[1], (1, Dh), jnp.float32, -bound, bound)
            wk = jax.random.uniform(ks[2], (self.n_models, H, Dh), jnp.float32,
                                    -bound, bound)
            bk = jax.random.uniform(ks[3], (self.n_models, Dh), jnp.float32,
                                    -bound, bound)
            # reuse_target_query_as_key=True: the target model's key layer IS
            # the query layer.
            wk = wk.at[query_idx].set(wq)
            bk = bk.at[query_idx].set(bq[0])
            wv = jax.random.uniform(ks[4], (self.n_models, H, Do), jnp.float32,
                                    -bound, bound)
            bv = jax.random.uniform(ks[5], (self.n_models, Do), jnp.float32,
                                    -bound, bound)
            # fused key|value projection weights, built once at init
            wkv = jnp.concatenate([wk, wv], axis=-1)            # (M, H, Dh+Do)
            bkv = jnp.concatenate([bk, bv], axis=-1)[:, None, :]  # (M, 1, Dh+Do)
            self.params = dict(wq=wq, bq=bq, wk=wk, bk=bk, wv=wv, bv=bv,
                               wkv=wkv, bkv=bkv, dh=Dh, do=Do)

    def __call__(self, hidden_states_per_model):
        """hidden_states_per_model: {model_id: (B, T, H)} — the
        last_hidden_state of each backbone.  Returns (aggregated, cossim_dict)."""
        ids = self.model_ids
        B, T, H = hidden_states_per_model[ids[0]].shape
        N = B * T
        # No jnp.stack: each model's hidden state is reshaped (a free view) and
        # streamed into the kernel as its own pipelined input.
        xs = [hidden_states_per_model[mid].reshape(N, H) for mid in ids]

        ti = (ids.index(self.cossim_target_embed_key)
              if self.cossim_target_embed_key is not None else None)

        if self.aggregate_type in ("mean", "sum"):
            agg, cos_vec = aggregate_reduce_pallas(
                xs, op=self.aggregate_type, normalize=self.normalize_embeddings,
                cossim_target_idx=ti, row_tile_cap=self.row_tile_cap)
        elif self.aggregate_type == "attention":
            agg, cos_vec = attention_aggregate_pallas(
                xs, self.params, query_idx=self.query_idx,
                normalize=self.normalize_embeddings, cossim_target_idx=ti,
                row_tile_cap=self.row_tile_cap, matmul_dtype=self.matmul_dtype)
        else:
            raise NotImplementedError(self.aggregate_type)

        cossim_dict = {}
        if ti is not None:
            for m, mid in enumerate(ids):
                if mid != self.cossim_target_embed_key:
                    cossim_dict[self.cossim_target_embed_key + "/" + mid] = \
                        cos_vec[m]

        return agg.reshape(B, T, -1), cossim_dict


# ----------------------------------------------------------------------------
# Pure-JAX reference (for correctness check)
# ----------------------------------------------------------------------------

def _ref_forward(model, hidden_states_per_model):
    ids = model.model_ids
    B, T, H = hidden_states_per_model[ids[0]].shape
    N = B * T
    x_all = jnp.stack(
        [hidden_states_per_model[mid].reshape(N, H).astype(jnp.float32)
         for mid in ids], axis=0)
    if model.normalize_embeddings:
        nrm = jnp.sqrt(jnp.sum(x_all * x_all, axis=-1, keepdims=True))
        x_all = x_all / jnp.maximum(nrm, _NORM_EPS)

    cossim_dict = {}
    if model.cossim_target_embed_key is not None:
        ti = ids.index(model.cossim_target_embed_key)
        a = x_all[ti]
        an = jnp.sqrt(jnp.sum(a * a, axis=-1))
        for m, mid in enumerate(ids):
            if mid != model.cossim_target_embed_key:
                b = x_all[m]
                bn = jnp.sqrt(jnp.sum(b * b, axis=-1))
                cos = jnp.sum(a * b, axis=-1) / jnp.maximum(an * bn, _COS_EPS)
                cossim_dict[model.cossim_target_embed_key + "/" + mid] = \
                    jnp.mean(cos)

    if model.aggregate_type == "mean":
        agg = jnp.mean(x_all, axis=0)
    elif model.aggregate_type == "sum":
        agg = jnp.sum(x_all, axis=0)
    else:
        p = model.params
        Dh = p["wq"].shape[1]
        q = x_all[model.query_idx] @ p["wq"] + p["bq"][0]                 # (N, Dh)
        ks = jnp.einsum("mnh,mhd->mnd", x_all, p["wk"]) + p["bk"][:, None, :]
        vs = jnp.einsum("mnh,mhd->mnd", x_all, p["wv"]) + p["bv"][:, None, :]
        scores = jnp.einsum("nd,mnd->nm", q, ks) / jnp.sqrt(jnp.float32(Dh))
        w = jax.nn.softmax(scores, axis=-1)
        agg = jnp.einsum("nm,mnd->nd", w, vs)
    return agg.reshape(B, T, -1), cossim_dict


# ----------------------------------------------------------------------------
# Main
# ----------------------------------------------------------------------------

if __name__ == "__main__":
    H = 32
    model_ids = ["model_a", "model_b", "model_c"]

    key = jax.random.PRNGKey(0)
    k_data, k_param = jax.random.split(key)

    configs = [
        dict(aggregate="attention", normalize_embeddings=True,
             cossim_target_embed_key="model_a"),
        dict(aggregate="mean", normalize_embeddings=False,
             cossim_target_embed_key=None),
        dict(aggregate="sum", normalize_embeddings=True,
             cossim_target_embed_key="model_a"),
    ]

    # (B, T, row_tile_cap): the second case forces a multi-step grid with a
    # partial tail block, exercising the in-kernel tail-row masking and the
    # resident cross-step cosine-similarity accumulator.
    shape_cases = [
        (2, 8, None),
        (2, 21, 16),
    ]

    for (B, T, cap) in shape_cases:
        dkeys = jax.random.split(k_data, len(model_ids))
        hidden_states = {
            mid: jax.random.normal(dkeys[i], (B, T, H), jnp.float32)
            for i, mid in enumerate(model_ids)
        }

        for cfg in configs:
            model = TransformerMultiModelPallas(
                model_ids, input_size=H, agg_hidden_size=32, query_idx=0,
                row_tile_cap=cap, key=k_param, **cfg)

            agg, cossims = model(hidden_states)
            agg = jax.block_until_ready(agg)
            cossims = {k: jax.block_until_ready(v) for k, v in cossims.items()}

            agg_ref, cossims_ref = _ref_forward(model, hidden_states)
            np.testing.assert_allclose(np.asarray(agg), np.asarray(agg_ref),
                                       rtol=1e-5, atol=1e-5)
            assert set(cossims.keys()) == set(cossims_ref.keys())
            for k in cossims_ref:
                np.testing.assert_allclose(np.asarray(cossims[k]),
                                           np.asarray(cossims_ref[k]),
                                           rtol=1e-5, atol=1e-5)

    print("KERNEL_OK")
</pallas_src>

<mosaic_0001>
module attributes {stable_mosaic.version = 11 : i64} {
  func.func @_attn_agg_kernel(%arg0: i32, %arg1: memref<16x32xf32, #tpu.memory_space<vmem>>, %arg2: memref<16x32xf32, #tpu.memory_space<vmem>>, %arg3: memref<16x32xf32, #tpu.memory_space<vmem>>, %arg4: memref<3x32x64xf32, #tpu.memory_space<vmem>>, %arg5: memref<3x1x64xf32, #tpu.memory_space<vmem>>, %arg6: memref<16x32xf32, #tpu.memory_space<vmem>>, %arg7: memref<1x3xf32, #tpu.memory_space<vmem>>) attributes {dimension_semantics = [#tpu.dimension_semantics<arbitrary>], iteration_bounds = array<i64: 1>, scalar_prefetch = 0 : i64, scratch_operands = 0 : i64, tpu.core_type = #tpu.core_type<tc>, window_params = [{transform_indices = @transform_0, window_bounds = array<i64: 16, 32>}, {transform_indices = @transform_1, window_bounds = array<i64: 16, 32>}, {transform_indices = @transform_2, window_bounds = array<i64: 16, 32>}, {pipeline_mode = #tpu.pipeline_mode<synchronous>, transform_indices = @transform_3, window_bounds = array<i64: 3, 32, 64>}, {pipeline_mode = #tpu.pipeline_mode<synchronous>, transform_indices = @transform_4, window_bounds = array<i64: 3, 1, 64>}, {transform_indices = @transform_5, window_bounds = array<i64: 16, 32>}, {pipeline_mode = #tpu.pipeline_mode<synchronous>, transform_indices = @transform_6, window_bounds = array<i64: 1, 3>}]} {
    %c0 = arith.constant 0 : index
    %c0_0 = arith.constant 0 : index
    %0 = vector.load %arg1[%c0, %c0_0] : memref<16x32xf32, #tpu.memory_space<vmem>>, vector<16x32xf32>
    %c0_1 = arith.constant 0 : index
    %c0_2 = arith.constant 0 : index
    %1 = vector.load %arg2[%c0_1, %c0_2] : memref<16x32xf32, #tpu.memory_space<vmem>>, vector<16x32xf32>
    %c0_3 = arith.constant 0 : index
    %c0_4 = arith.constant 0 : index
    %2 = vector.load %arg3[%c0_3, %c0_4] : memref<16x32xf32, #tpu.memory_space<vmem>>, vector<16x32xf32>
    %3 = arith.mulf %0, %0 : vector<16x32xf32>
    %cst = arith.constant dense<0.000000e+00> : vector<16xf32>
    %4 = vector.multi_reduction <add>, %3, %cst [1] : vector<16x32xf32> to vector<16xf32>
    %5 = vector.shape_cast %4 : vector<16xf32> to vector<16x1xf32>
    %6 = arith.mulf %1, %1 : vector<16x32xf32>
    %cst_5 = arith.constant dense<0.000000e+00> : vector<16xf32>
    %7 = vector.multi_reduction <add>, %6, %cst_5 [1] : vector<16x32xf32> to vector<16xf32>
    %8 = vector.shape_cast %7 : vector<16xf32> to vector<16x1xf32>
    %9 = arith.mulf %2, %2 : vector<16x32xf32>
    %cst_6 = arith.constant dense<0.000000e+00> : vector<16xf32>
    %10 = vector.multi_reduction <add>, %9, %cst_6 [1] : vector<16x32xf32> to vector<16xf32>
    %11 = vector.shape_cast %10 : vector<16xf32> to vector<16x1xf32>
    %12 = math.sqrt %5 : vector<16x1xf32>
    %cst_7 = arith.constant 9.99999996E-13 : f32
    %13 = vector.broadcast %cst_7 : f32 to vector<16x1xf32>
    %14 = arith.maximumf %12, %13 : vector<16x1xf32>
    %cst_8 = arith.constant 1.000000e+00 : f32
    %15 = vector.broadcast %cst_8 : f32 to vector<16x1xf32>
    %16 = arith.divf %15, %14 : vector<16x1xf32>
    %17 = math.sqrt %8 : vector<16x1xf32>
    %cst_9 = arith.constant 9.99999996E-13 : f32
    %18 = vector.broadcast %cst_9 : f32 to vector<16x1xf32>
    %19 = arith.maximumf %17, %18 : vector<16x1xf32>
    %cst_10 = arith.constant 1.000000e+00 : f32
    %20 = vector.broadcast %cst_10 : f32 to vector<16x1xf32>
    %21 = arith.divf %20, %19 : vector<16x1xf32>
    %22 = math.sqrt %11 : vector<16x1xf32>
    %cst_11 = arith.constant 9.99999996E-13 : f32
    %23 = vector.broadcast %cst_11 : f32 to vector<16x1xf32>
    %24 = arith.maximumf %22, %23 : vector<16x1xf32>
    %cst_12 = arith.constant 1.000000e+00 : f32
    %25 = vector.broadcast %cst_12 : f32 to vector<16x1xf32>
    %26 = arith.divf %25, %24 : vector<16x1xf32>
    %c0_13 = arith.constant 0 : index
    %c0_14 = arith.constant 0 : index
    %c0_15 = arith.constant 0 : index
    %27 = vector.load %arg4[%c0_13, %c0_14, %c0_15] : memref<3x32x64xf32, #tpu.memory_space<vmem>>, vector<1x32x64xf32>
    %28 = vector.shape_cast %27 : vector<1x32x64xf32> to vector<32x64xf32>
    %cst_16 = arith.constant dense<0.000000e+00> : vector<16x64xf32>
    %29 = tpu.matmul %0, %28, %cst_16 {dimension_numbers = #tpu.dot_dimension_numbers<[1], [0], [0], [1], [0, 0, 1, 1], [], []>} : vector<16x32xf32>, vector<32x64xf32>, vector<16x64xf32> -> vector<16x64xf32>
    %30 = vector.broadcast %16 : vector<16x1xf32> to vector<16x64xf32>
    %31 = arith.mulf %29, %30 : vector<16x64xf32>
    %c0_17 = arith.constant 0 : index
    %c0_18 = arith.constant 0 : index
    %c0_19 = arith.constant 0 : index
    %32 = vector.load %arg5[%c0_17, %c0_18, %c0_19] : memref<3x1x64xf32, #tpu.memory_space<vmem>>, vector<1x1x64xf32>
    %33 = vector.shape_cast %32 : vector<1x1x64xf32> to vector<1x64xf32>
    %34 = vector.broadcast %33 : vector<1x64xf32> to vector<16x64xf32>
    %35 = arith.addf %31, %34 : vector<16x64xf32>
    %36 = vector.extract_strided_slice %35 {offsets = [0, 0], sizes = [16, 32], strides = [1, 1]} : vector<16x64xf32> to vector<16x32xf32>
    %37 = vector.extract_strided_slice %35 {offsets = [0, 32], sizes = [16, 32], strides = [1, 1]} : vector<16x64xf32> to vector<16x32xf32>
    %38 = arith.mulf %36, %36 : vector<16x32xf32>
    %cst_20 = arith.constant dense<0.000000e+00> : vector<16xf32>
    %39 = vector.multi_reduction <add>, %38, %cst_20 [1] : vector<16x32xf32> to vector<16xf32>
    %40 = vector.shape_cast %39 : vector<16xf32> to vector<16x1xf32>
    %cst_21 = arith.constant 0.176776692 : f32
    %41 = vector.broadcast %cst_21 : f32 to vector<16x1xf32>
    %42 = arith.mulf %40, %41 : vector<16x1xf32>
    %c1 = arith.constant 1 : index
    %c0_22 = arith.constant 0 : index
    %c0_23 = arith.constant 0 : index
    %43 = vector.load %arg4[%c1, %c0_22, %c0_23] : memref<3x32x64xf32, #tpu.memory_space<vmem>>, vector<1x32x64xf32>
    %44 = vector.shape_cast %43 : vector<1x32x64xf32> to vector<32x64xf32>
    %cst_24 = arith.constant dense<0.000000e+00> : vector<16x64xf32>
    %45 = tpu.matmul %1, %44, %cst_24 {dimension_numbers = #tpu.dot_dimension_numbers<[1], [0], [0], [1], [0, 0, 1, 1], [], []>} : vector<16x32xf32>, vector<32x64xf32>, vector<16x64xf32> -> vector<16x64xf32>
    %46 = vector.broadcast %21 : vector<16x1xf32> to vector<16x64xf32>
    %47 = arith.mulf %45, %46 : vector<16x64xf32>
    %c1_25 = arith.constant 1 : index
    %c0_26 = arith.constant 0 : index
    %c0_27 = arith.constant 0 : index
    %48 = vector.load %arg5[%c1_25, %c0_26, %c0_27] : memref<3x1x64xf32, #tpu.memory_space<vmem>>, vector<1x1x64xf32>
    %49 = vector.shape_cast %48 : vector<1x1x64xf32> to vector<1x64xf32>
    %50 = vector.broadcast %49 : vector<1x64xf32> to vector<16x64xf32>
    %51 = arith.addf %47, %50 : vector<16x64xf32>
    %52 = vector.extract_strided_slice %51 {offsets = [0, 0], sizes = [16, 32], strides = [1, 1]} : vector<16x64xf32> to vector<16x32xf32>
    %53 = vector.extract_strided_slice %51 {offsets = [0, 32], sizes = [16, 32], strides = [1, 1]} : vector<16x64xf32> to vector<16x32xf32>
    %54 = arith.mulf %36, %52 : vector<16x32xf32>
    %cst_28 = arith.constant dense<0.000000e+00> : vector<16xf32>
    %55 = vector.multi_reduction <add>, %54, %cst_28 [1] : vector<16x32xf32> to vector<16xf32>
    %56 = vector.shape_cast %55 : vector<16xf32> to vector<16x1xf32>
    %cst_29 = arith.constant 0.176776692 : f32
    %57 = vector.broadcast %cst_29 : f32 to vector<16x1xf32>
    %58 = arith.mulf %56, %57 : vector<16x1xf32>
    %c2 = arith.constant 2 : index
    %c0_30 = arith.constant 0 : index
    %c0_31 = arith.constant 0 : index
    %59 = vector.load %arg4[%c2, %c0_30, %c0_31] : memref<3x32x64xf32, #tpu.memory_space<vmem>>, vector<1x32x64xf32>
    %60 = vector.shape_cast %59 : vector<1x32x64xf32> to vector<32x64xf32>
    %cst_32 = arith.constant dense<0.000000e+00> : vector<16x64xf32>
    %61 = tpu.matmul %2, %60, %cst_32 {dimension_numbers = #tpu.dot_dimension_numbers<[1], [0], [0], [1], [0, 0, 1, 1], [], []>} : vector<16x32xf32>, vector<32x64xf32>, vector<16x64xf32> -> vector<16x64xf32>
    %62 = vector.broadcast %26 : vector<16x1xf32> to vector<16x64xf32>
    %63 = arith.mulf %61, %62 : vector<16x64xf32>
    %c2_33 = arith.constant 2 : index
    %c0_34 = arith.constant 0 : index
    %c0_35 = arith.constant 0 : index
    %64 = vector.load %arg5[%c2_33, %c0_34, %c0_35] : memref<3x1x64xf32, #tpu.memory_space<vmem>>, vector<1x1x64xf32>
    %65 = vector.shape_cast %64 : vector<1x1x64xf32> to vector<1x64xf32>
    %66 = vector.broadcast %65 : vector<1x64xf32> to vector<16x64xf32>
    %67 = arith.addf %63, %66 : vector<16x64xf32>
    %68 = vector.extract_strided_slice %67 {offsets = [0, 0], sizes = [16, 32], strides = [1, 1]} : vector<16x64xf32> to vector<16x32xf32>
    %69 = vector.extract_strided_slice %67 {offsets = [0, 32], sizes = [16, 32], strides = [1, 1]} : vector<16x64xf32> to vector<16x32xf32>
    %70 = arith.mulf %36, %68 : vector<16x32xf32>
    %cst_36 = arith.constant dense<0.000000e+00> : vector<16xf32>
    %71 = vector.multi_reduction <add>, %70, %cst_36 [1] : vector<16x32xf32> to vector<16xf32>
    %72 = vector.shape_cast %71 : vector<16xf32> to vector<16x1xf32>
    %cst_37 = arith.constant 0.176776692 : f32
    %73 = vector.broadcast %cst_37 : f32 to vector<16x1xf32>
    %74 = arith.mulf %72, %73 : vector<16x1xf32>
    %75 = arith.maximumf %42, %58 : vector<16x1xf32>
    %76 = arith.maximumf %75, %74 : vector<16x1xf32>
    %77 = arith.subf %42, %76 : vector<16x1xf32>
    %78 = math.exp %77 : vector<16x1xf32>
    %79 = arith.subf %58, %76 : vector<16x1xf32>
    %80 = math.exp %79 : vector<16x1xf32>
    %81 = arith.subf %74, %76 : vector<16x1xf32>
    %82 = math.exp %81 : vector<16x1xf32>
    %83 = arith.addf %78, %80 : vector<16x1xf32>
    %84 = arith.addf %83, %82 : vector<16x1xf32>
    %85 = tpu.reciprocal %84 : vector<16x1xf32> -> vector<16x1xf32>
    %86 = arith.mulf %78, %85 : vector<16x1xf32>
    %87 = vector.broadcast %86 : vector<16x1xf32> to vector<16x32xf32>
    %88 = arith.mulf %87, %37 : vector<16x32xf32>
    %89 = arith.mulf %80, %85 : vector<16x1xf32>
    %90 = vector.broadcast %89 : vector<16x1xf32> to vector<16x32xf32>
    %91 = arith.mulf %90, %53 : vector<16x32xf32>
    %92 = arith.addf %88, %91 : vector<16x32xf32>
    %93 = arith.mulf %82, %85 : vector<16x1xf32>
    %94 = vector.broadcast %93 : vector<16x1xf32> to vector<16x32xf32>
    %95 = arith.mulf %94, %69 : vector<16x32xf32>
    %96 = arith.addf %92, %95 : vector<16x32xf32>
    %c0_38 = arith.constant 0 : index
    %c0_39 = arith.constant 0 : index
    %97 = vector.load %arg6[%c0_38, %c0_39] : memref<16x32xf32, #tpu.memory_space<vmem>>, vector<16x32xf32>
    tpu.vector_store %arg6[%c0_38, %c0_39], %96 {strides = array<i32>} : memref<16x32xf32, #tpu.memory_space<vmem>>, vector<16x32xf32>,
    %c0_i32 = arith.constant 0 : i32
    %98 = arith.cmpi eq, %arg0, %c0_i32 : i32
    %99 = arith.extui %98 : i1 to i32
    %c0_i32_40 = arith.constant 0 : i32
    %100 = arith.cmpi ne, %99, %c0_i32_40 : i32
    scf.if %100 {
      %cst_55 = arith.constant 0.000000e+00 : f32
      %154 = vector.broadcast %cst_55 : f32 to vector<1x3xf32>
      %c0_56 = arith.constant 0 : index
      %c0_57 = arith.constant 0 : index
      %155 = vector.load %arg7[%c0_56, %c0_57] : memref<1x3xf32, #tpu.memory_space<vmem>>, vector<1x3xf32>
      tpu.vector_store %arg7[%c0_56, %c0_57], %154 {strides = array<i32>} : memref<1x3xf32, #tpu.memory_space<vmem>>, vector<1x3xf32>,
    } else {
    }
    %c16_i32 = arith.constant 16 : i32
    %101 = arith.muli %arg0, %c16_i32 : i32
    %102 = tpu.iota {dimensions = array<i32: 0>} : vector<16x1xi32>
    %103 = vector.broadcast %101 : i32 to vector<16x1xi32>
    %104 = arith.addi %103, %102 : vector<16x1xi32>
    %c16_i32_41 = arith.constant 16 : i32
    %105 = vector.broadcast %c16_i32_41 : i32 to vector<16x1xi32>
    %106 = arith.cmpi slt, %104, %105 : vector<16x1xi32>
    %107 = tpu.iota {dimensions = array<i32: 1>} : vector<1x3xi32>
    %108 = math.sqrt %5 : vector<16x1xf32>
    %109 = math.sqrt %8 : vector<16x1xf32>
    %110 = math.sqrt %11 : vector<16x1xf32>
    %111 = arith.mulf %108, %16 : vector<16x1xf32>
    %cst_42 = arith.constant 0.000000e+00 : f32
    %112 = vector.broadcast %cst_42 : f32 to vector<1x3xf32>
    %113 = arith.mulf %0, %1 : vector<16x32xf32>
    %cst_43 = arith.constant dense<0.000000e+00> : vector<16xf32>
    %114 = vector.multi_reduction <add>, %113, %cst_43 [1] : vector<16x32xf32> to vector<16xf32>
    %115 = vector.shape_cast %114 : vector<16xf32> to vector<16x1xf32>
    %116 = arith.mulf %115, %16 : vector<16x1xf32>
    %117 = arith.mulf %116, %21 : vector<16x1xf32>
    %118 = arith.mulf %109, %21 : vector<16x1xf32>
    %119 = arith.mulf %111, %118 : vector<16x1xf32>
    %cst_44 = arith.constant 9.99999997E-7 : f32
    %120 = vector.broadcast %cst_44 : f32 to vector<16x1xf32>
    %121 = arith.maximumf %119, %120 : vector<16x1xf32>
    %122 = arith.divf %117, %121 : vector<16x1xf32>
    %cst_45 = arith.constant 0.000000e+00 : f32
    %123 = vector.broadcast %cst_45 : f32 to vector<16x1xf32>
    %124 = arith.select %106, %122, %123 : vector<16x1xi1>, vector<16x1xf32>
    %cst_46 = arith.constant dense<0.000000e+00> : vector<1xf32>
    %125 = vector.multi_reduction <add>, %124, %cst_46 [0] : vector<16x1xf32> to vector<1xf32>
    %126 = vector.shape_cast %125 : vector<1xf32> to vector<1x1xf32>
    %c1_i32 = arith.constant 1 : i32
    %127 = vector.broadcast %c1_i32 : i32 to vector<1x3xi32>
    %128 = arith.cmpi eq, %107, %127 : vector<1x3xi32>
    %129 = vector.broadcast %126 : vector<1x1xf32> to vector<1x3xf32>
    %130 = arith.addf %112, %129 : vector<1x3xf32>
    %131 = arith.select %128, %130, %112 : vector<1x3xi1>, vector<1x3xf32>
    %132 = arith.mulf %0, %2 : vector<16x32xf32>
    %cst_47 = arith.constant dense<0.000000e+00> : vector<16xf32>
    %133 = vector.multi_reduction <add>, %132, %cst_47 [1] : vector<16x32xf32> to vector<16xf32>
    %134 = vector.shape_cast %133 : vector<16xf32> to vector<16x1xf32>
    %135 = arith.mulf %134, %16 : vector<16x1xf32>
    %136 = arith.mulf %135, %26 : vector<16x1xf32>
    %137 = arith.mulf %110, %26 : vector<16x1xf32>
    %138 = arith.mulf %111, %137 : vector<16x1xf32>
    %cst_48 = arith.constant 9.99999997E-7 : f32
    %139 = vector.broadcast %cst_48 : f32 to vector<16x1xf32>
    %140 = arith.maximumf %138, %139 : vector<16x1xf32>
    %141 = arith.divf %136, %140 : vector<16x1xf32>
    %cst_49 = arith.constant 0.000000e+00 : f32
    %142 = vector.broadcast %cst_49 : f32 to vector<16x1xf32>
    %143 = arith.select %106, %141, %142 : vector<16x1xi1>, vector<16x1xf32>
    %cst_50 = arith.constant dense<0.000000e+00> : vector<1xf32>
    %144 = vector.multi_reduction <add>, %143, %cst_50 [0] : vector<16x1xf32> to vector<1xf32>
    %145 = vector.shape_cast %144 : vector<1xf32> to vector<1x1xf32>
    %c2_i32 = arith.constant 2 : i32
    %146 = vector.broadcast %c2_i32 : i32 to vector<1x3xi32>
    %147 = arith.cmpi eq, %107, %146 : vector<1x3xi32>
    %148 = vector.broadcast %145 : vector<1x1xf32> to vector<1x3xf32>
    %149 = arith.addf %131, %148 : vector<1x3xf32>
    %150 = arith.select %147, %149, %131 : vector<1x3xi1>, vector<1x3xf32>
    %c0_51 = arith.constant 0 : index
    %c0_52 = arith.constant 0 : index
    %151 = vector.load %arg7[%c0_51, %c0_52] : memref<1x3xf32, #tpu.memory_space<vmem>>, vector<1x3xf32>
    %152 = arith.addf %151, %150 : vector<1x3xf32>
    %c0_53 = arith.constant 0 : index
    %c0_54 = arith.constant 0 : index
    %153 = vector.load %arg7[%c0_53, %c0_54] : memref<1x3xf32, #tpu.memory_space<vmem>>, vector<1x3xf32>
    tpu.vector_store %arg7[%c0_53, %c0_54], %152 {strides = array<i32>} : memref<1x3xf32, #tpu.memory_space<vmem>>, vector<1x3xf32>,
    return
  }
  func.func @transform_0(%arg0: i32) -> (i32, i32) {
    %c0_i32 = arith.constant 0 : i32
    %c0_i32_0 = arith.constant 0 : i32
    return %arg0, %c0_i32 : i32, i32
  }
  func.func @transform_1(%arg0: i32) -> (i32, i32) {
    %c0_i32 = arith.constant 0 : i32
    %c0_i32_0 = arith.constant 0 : i32
    return %arg0, %c0_i32 : i32, i32
  }
  func.func @transform_2(%arg0: i32) -> (i32, i32) {
    %c0_i32 = arith.constant 0 : i32
    %c0_i32_0 = arith.constant 0 : i32
    return %arg0, %c0_i32 : i32, i32
  }
  func.func @transform_3(%arg0: i32) -> (i32, i32, i32) {
    %c0_i32 = arith.constant 0 : i32
    %c0_i32_0 = arith.constant 0 : i32
    %c0_i32_1 = arith.constant 0 : i32
    %c0_i32_2 = arith.constant 0 : i32
    return %c0_i32, %c0_i32_0, %c0_i32_1 : i32, i32, i32
  }
  func.func @transform_4(%arg0: i32) -> (i32, i32, i32) {
    %c0_i32 = arith.constant 0 : i32
    %c0_i32_0 = arith.constant 0 : i32
    %c0_i32_1 = arith.constant 0 : i32
    %c0_i32_2 = arith.constant 0 : i32
    return %c0_i32, %c0_i32_0, %c0_i32_1 : i32, i32, i32
  }
  func.func @transform_5(%arg0: i32) -> (i32, i32) {
    %c0_i32 = arith.constant 0 : i32
    %c0_i32_0 = arith.constant 0 : i32
    return %arg0, %c0_i32 : i32, i32
  }
  func.func @transform_6(%arg0: i32) -> (i32, i32) {
    %c0_i32 = arith.constant 0 : i32
    %c0_i32_0 = arith.constant 0 : i32
    %c0_i32_1 = arith.constant 0 : i32
    return %c0_i32, %c0_i32_0 : i32, i32
  }
}

</mosaic_0001>

<bundles_post_ra>
// kernel: tpu_custom_call.1
= control target key start
LH: loop header
LB: loop body
LE: loop exit
PB: predicated region body
PF: predicated region fallthrough
CT: control target
= control target key end

     0   :  { %12 = vsyncpa [#allocation3], 0  ;;  %s1250_s0 = inlined_call_operand.hbm [shape: f32[16,32], index: 0, kind: input, shape index: {}]   ;;  %s1251_s1 = inlined_call_operand.hbm [shape: f32[16,32], index: 1, kind: input, shape index: {}]   ;;  %s1252_s2 = inlined_call_operand.hbm [shape: f32[16,32], index: 2, kind: input, shape index: {}]   ;;  %s1253_s3 = inlined_call_operand.hbm [shape: f32[3,32,64], index: 3, kind: input, shape index: {}]   ;;  %s1254_s4 = inlined_call_operand.vmem [shape: f32[3,1,64], index: 4, kind: input, shape index: {}]   ;;  %s1255_s5 = inlined_call_operand.hbm [shape: f32[16,32], index: 5, kind: output, shape index: {0}]   ;;  %s1256_s6 = inlined_call_operand.hbm [shape: f32[1,3], index: 6, kind: output, shape index: {1}]  }
   0x1   :  { %13 = vsyncpa [#allocation6], 0 }
   0x2   :  { %14 = vsyncpa [#allocation9], 0 }
   0x3   :  { %15 = vsyncpa [#allocation4], 0 }
   0x4   :  { %16 = vsyncpa [#allocation12], 0  ;;  %s956_s21 = smov [#allocation5]   ;;  %s957_s23 = smov [#allocation2]  }
   0x5   :  { %s34_s22 = sshll.u32 %s956_s21, 4  ;;  %s22_s24 = sshll.u32 %s957_s23, 4  ;;  %s35_s22 = int_to_ptr.vmem [resolvable:$true] %s34_s22  ;;  %s1001_s24 = int_to_ptr.vmem [resolvable:$true] %s22_s24 }
   0x6   :  { %s814_s27 = scalar_lea.hbm %s1251_s1, 256 }
   0x7   :  { %p815_p0 = scmp.ne.s32.totalorder %s1251_s1, %s814_s27  ;;  %p818_p1 = scmp.lt.u32.totalorder %s814_s27, %s1251_s1 }
   0x9   :  { %p820_p2 = pnand %p818_p1, %p815_p0 }
   0xb   :  { %823 = shalt.err (!%p820_p2)
}
   0xc   :  { %s824_s8 = scalar_lea.vmem %s35_s22, 256  ;;  %p829_p4 = scmp.lt.s32.totalorder %s35_s22, %s35_s22 }
   0xd   :  { %p825_p3 = scmp.ne.s32.totalorder %s35_s22, %s824_s8  ;;  %p830_p5 = scmp.lt.s32.totalorder %s824_s8, %s824_s8 }
   0xf   :  { %p831_p6 = por %p830_p5, %p829_p4 }
  0x11   :  { %p832_p7 = pnand %p831_p6, %p825_p3 }
  0x13   :  { %835 = shalt.err (!%p832_p7)
}
  0x14   :  { %s958_s9 = smov 128   ;;  %s959_s10 = smov 8  }
  0x15   :  { %40 = dma.hbm_to_vmem [thread:$0]  %s1251_s1, 256, %s35_s22, [#allocation6], %s958_s9, %s958_s9, %s959_s10  }
  0x16   :  { %s836_s15 = scalar_lea.hbm %s1250_s0, 256 }
  0x17   :  { %p837_p8 = scmp.ne.s32.totalorder %s1250_s0, %s836_s15  ;;  %p840_p9 = scmp.lt.u32.totalorder %s836_s15, %s1250_s0 }
  0x19   :  { %p842_p10 = pnand %p840_p9, %p837_p8 }
  0x1b   :  { %845 = shalt.err (!%p842_p10)
}
  0x1c   :  { %s846_s20 = scalar_lea.vmem %s1001_s24, 256  ;;  %p851_p12 = scmp.lt.s32.totalorder %s1001_s24, %s1001_s24 }
  0x1d   :  { %p847_p11 = scmp.ne.s32.totalorder %s1001_s24, %s846_s20  ;;  %p852_p13 = scmp.lt.s32.totalorder %s846_s20, %s846_s20 }
  0x1f   :  { %p853_p0 = por %p852_p13, %p851_p12 }
  0x21   :  { %p854_p1 = pnand %p853_p0, %p847_p11 }
  0x23   :  { %857 = shalt.err (!%p854_p1)
}
  0x24   :  { %28 = dma.hbm_to_vmem [thread:$0]  %s1250_s0, 256, %s1001_s24, [#allocation3], %s958_s9, %s958_s9, %s959_s10  }
  0x25   :  { %s960_s22 = smov [#allocation7]   ;;  %s961_s25 = smov [#allocation8]  }
  0x26   :  { %s46_s23 = sshll.u32 %s960_s22, 4  ;;  %s58_s26 = sshll.u32 %s961_s25, 4  ;;  %s47_s23 = int_to_ptr.vmem [resolvable:$true] %s46_s23  ;;  %s1038_s26 = int_to_ptr.vmem [resolvable:$true] %s58_s26 }
  0x27   :  { %s858_s29 = scalar_lea.hbm %s1252_s2, 256 }
  0x28   :  { %p859_p2 = scmp.ne.s32.totalorder %s1252_s2, %s858_s29  ;;  %p862_p3 = scmp.lt.u32.totalorder %s858_s29, %s1252_s2 }
  0x2a   :  { %p864_p4 = pnand %p862_p3, %p859_p2 }
  0x2c   :  { %867 = shalt.err (!%p864_p4)
}
  0x2d   :  { %s868_s0 = scalar_lea.vmem %s47_s23, 256  ;;  %p873_p6 = scmp.lt.s32.totalorder %s47_s23, %s47_s23 }
  0x2e   :  { %p869_p5 = scmp.ne.s32.totalorder %s47_s23, %s868_s0  ;;  %p874_p7 = scmp.lt.s32.totalorder %s868_s0, %s868_s0 }
  0x30   :  { %p875_p8 = por %p874_p7, %p873_p6 }
  0x32   :  { %p876_p9 = pnand %p875_p8, %p869_p5 }
  0x34   :  { %879 = shalt.err (!%p876_p9)
}
  0x35   :  { %52 = dma.hbm_to_vmem [thread:$0]  %s1252_s2, 256, %s47_s23, [#allocation6], %s958_s9, %s958_s9, %s959_s10  }
  0x36   :  { %s880_s15 = scalar_lea.hbm %s1253_s3, 1536 }
  0x37   :  { %p881_p10 = scmp.ne.s32.totalorder %s1253_s3, %s880_s15  ;;  %p884_p11 = scmp.lt.u32.totalorder %s880_s15, %s1253_s3 }
  0x39   :  { %p886_p12 = pnand %p884_p11, %p881_p10 }
  0x3b   :  { %889 = shalt.err (!%p886_p12)
}
  0x3c   :  { %s890_s20 = scalar_lea.vmem %s1038_s26, 1536  ;;  %p895_p0 = scmp.lt.s32.totalorder %s1038_s26, %s1038_s26 }
  0x3d   :  { %p891_p13 = scmp.ne.s32.totalorder %s1038_s26, %s890_s20  ;;  %p896_p1 = scmp.lt.s32.totalorder %s890_s20, %s890_s20 }
  0x3f   :  { %p897_p2 = por %p896_p1, %p895_p0 }
  0x41   :  { %p898_p3 = pnand %p897_p2, %p891_p13 }
  0x43   :  { %901 = shalt.err (!%p898_p3)
}
  0x44   :  { %64 = dma.hbm_to_vmem [thread:$0]  %s1253_s3, 1536, %s1038_s26, [#allocation9], %s958_s9, %s958_s9, %s959_s10  }
  0x45   :  { %946 = dma.done.wait [#allocation3], 256  }
  0x46   :  { %947 = vsyncadd [#allocation3], 4294967040 }
  0x47   :  { %948 = dma.done.wait [#allocation6], 512  }
  0x48   :  { %949 = vsyncadd [#allocation6], 4294966784 }
  0x49   :  { %950 = dma.done.wait [#allocation9], 1536  }
  0x4a   :  { %951 = vsyncadd [#allocation9], 4294965760  ;;  %v170_v0 = vld [vmem:[#allocation8] sm:$0xff]  ;;  %v171_v1 = vld [vmem:[#allocation8 + $0x8] sm:$0xff]  ;;  %vm87_vm0 = vcmask 261120   ;;  %vm550_vm13 = vcmask 16384  }
  0x4b   :  { %v277_v2 = vld [vmem:[#allocation8 + $0x20] sm:$0xff]  ;;  %v732_v3 = vpack.c.bf16 %v171_v1, %v170_v0  ;;  %v278_v4 = vld [vmem:[#allocation8 + $0x28] sm:$0xff]  ;;  %v172_v5 = vld [vmem:[#allocation8 + $0x10] sm:$0xff] }
  0x4c   :  { %v173_v6 = vld [vmem:[#allocation8 + $0x18] sm:$0xff]  ;;  %v740_v7 = vpack.c.bf16 %v278_v4, %v277_v2  ;;  %v279_v9 = vld [vmem:[#allocation8 + $0x30] sm:$0xff]  ;;  %v1079_v13 = vld [vmem:[#allocation5] sm:$0xff] }
  0x4d   :  { %v736_v8 = vpack.c.bf16 %v173_v6, %v172_v5  ;;  %v280_v10 = vld [vmem:[#allocation8 + $0x38] sm:$0xff]  ;;  %v1075_v11 = vld [vmem:[#allocation2] sm:$0xff]  ;;  %733 = vmatprep.subr.bf16.mxu0 %v732_v3  ;;  %v385_v16 = vld [vmem:[#allocation8 + $0x40] sm:$0xff]  ;;  %v94_v18 = vmul.f32 %v1079_v13, %v1079_v13  ;;  %718 = vmatprep.mubr.msk.f32.mxu1 %vm87_vm0, %v1079_v13 }
  0x4e   :  { %v744_v12 = vpack.c.bf16 %v280_v10, %v279_v9  ;;  %707 = vmatprep.mubr.msk.f32.mxu0 %vm87_vm0, %v1075_v11  ;;  %v1081_v14 = vld [vmem:[#allocation2 + $0x8] sm:$0xff]  ;;  %v85_v15 = vmul.f32 %v1075_v11, %v1075_v11  ;;  %741 = vmatprep.subr.bf16.mxu1 %v740_v7  ;;  %v386_v17 = vld [vmem:[#allocation8 + $0x48] sm:$0xff]  ;;  %v387_v23 = vld [vmem:[#allocation8 + $0x50] sm:$0xff] }
  0x4f   :  { %735 = vmatpush3.bf16.msra.mxu0 %v732_v3  ;;  %v86_v19 = vmul.f32 %v1081_v14, %v1081_v14  ;;  %743 = vmatpush3.bf16.msra.mxu1 %v740_v7  ;;  %v748_v20 = vpack.c.bf16 %v386_v17, %v385_v16  ;;  %v1092_v22 = vld [vmem:[#allocation5 + $0x8] sm:$0xff]  ;;  %v388_v24 = vld [vmem:[#allocation8 + $0x58] sm:$0xff]  ;;  %v96_v25 = vsel %vm87_vm0, %v94_v18, 0.0  ;;  %v1095_v26 = vld [vmem:[#allocation7] sm:$0xff] }
  0x50   :  { %737 = vmatprep.subr.bf16.mxu0 %v736_v8  ;;  %v88_v21 = vsel %vm87_vm0, %v85_v15, 0.0  ;;  %745 = vmatprep.subr.bf16.mxu1 %v744_v12  ;;  %v95_v27 = vmul.f32 %v1092_v22, %v1092_v22  ;;  %v102_v29 = vmul.f32 %v1095_v26, %v1095_v26  ;;  %v752_v30 = vpack.c.bf16 %v388_v24, %v387_v23  ;;  %v1102_v31 = vld [vmem:[#allocation7 + $0x8] sm:$0xff] }
  0x51   :  { %89 = vadd.xlane.f32.xlu0 %v88_v21  ;;  %97 = vadd.xlane.f32.xlu1 %v96_v25  ;;  %v91_v28 = vsel %vm87_vm0, %v86_v19, 0.0  ;;  %v103_v33 = vmul.f32 %v1102_v31, %v1102_v31 }
  0x52   :  { %v99_v32 = vsel %vm87_vm0, %v95_v27, 0.0  ;;  %v104_v34 = vsel %vm87_vm0, %v102_v29, 0.0 }
  0x53   :  { %739 = vmatpush3.bf16.msra.mxu0 %v736_v8  ;;  %747 = vmatpush3.bf16.msra.mxu1 %v744_v12  ;;  %v107_v35 = vsel %vm87_vm0, %v103_v33, 0.0 }
  0x54   :  { %749 = vmatprep.subr.bf16.mxu0 %v748_v20 }
  0x55   :  { %92 = vadd.xlane.f32.xlu0 %v91_v28  ;;  %100 = vadd.xlane.f32.xlu1 %v99_v32 }
  0x56   :  { %708 = vmatmul.mubr.msk.f32.vlgmr.msra.gmra.mrb[0].mxu0 %vm87_vm0, %v1081_v14  ;;  %719 = vmatmul.mubr.msk.f32.vlgmr.msra.gmra.mrb[0].mxu1 %vm87_vm0, %v1092_v22 }
  0x57   :  { %751 = vmatpush3.bf16.msra.mxu0 %v748_v20  ;;  %729 = vmatprep.mubr.msk.f32.mxu0 %vm87_vm0, %v1095_v26 }
  0x58   :  { %753 = vmatprep.subr.bf16.mxu0 %v752_v30 }
  0x59   :  { %105 = vadd.xlane.f32.xlu0 %v104_v34  ;;  %108 = vadd.xlane.f32.xlu1 %v107_v35 }
  0x5b   :  { %755 = vmatpush3.bf16.msra.mxu0 %v752_v30 }
  0x5e   :  { %730 = vmatmul.mubr.msk.f32.vlgmr.msra.gmra.mrb[2].mxu0 %vm87_vm0, %v1102_v31 }
  0xde   :  { %v90_v36 = vpop.xlane.xlu0 %89  ;;  %v98_v37 = vpop.xlane.xlu1 %97 }
  0xdf   :  { %766 = vrsqrt.f32 %v90_v36  ;;  %vm112_vm1 = vcmp.eq.f32.partialorder %v90_v36, inf  ;;  %vm114_vm2 = vcmp.eq.f32.partialorder %v90_v36, 0.0  ;;  %v115_v42 = vand.u32 2147483648, %v90_v36 }
  0xe0   :  { %768 = vrsqrt.f32 %v98_v37  ;;  %vm132_vm3 = vcmp.eq.f32.partialorder %v98_v37, inf  ;;  %v135_v46 = vand.u32 2147483648, %v98_v37  ;;  %vm134_vm4 = vcmp.eq.f32.partialorder %v98_v37, 0.0 }
  0xe2   :  { %v93_v38 = vpop.xlane.xlu0 %92  ;;  %v101_v39 = vpop.xlane.xlu1 %100 }
  0xe3   :  { %770 = vrsqrt.f32 %v93_v38  ;;  %vm119_vm5 = vcmp.eq.f32.partialorder %v93_v38, inf  ;;  %v122_v52 = vand.u32 2147483648, %v93_v38  ;;  %vm121_vm6 = vcmp.eq.f32.partialorder %v93_v38, 0.0 }
  0xe4   :  { %772 = vrsqrt.f32 %v101_v39  ;;  %vm139_vm7 = vcmp.eq.f32.partialorder %v101_v39, inf  ;;  %vm141_vm8 = vcmp.eq.f32.partialorder %v101_v39, 0.0  ;;  %v142_v59 = vand.u32 2147483648, %v101_v39 }
  0xe6   :  { %v106_v40 = vpop.xlane.xlu0 %105  ;;  %v109_v43 = vpop.xlane.xlu1 %108 }
  0xe7   :  { %774 = vrsqrt.f32 %v106_v40  ;;  %vm152_vm9 = vcmp.eq.f32.partialorder %v106_v40, inf  ;;  %v155_v63 = vand.u32 2147483648, %v106_v40  ;;  %vm154_vm10 = vcmp.eq.f32.partialorder %v106_v40, 0.0 }
  0xe8   :  { %776 = vrsqrt.f32 %v109_v43  ;;  %vm159_vm11 = vcmp.eq.f32.partialorder %v109_v43, inf  ;;  %v162_v6 = vand.u32 2147483648, %v109_v43  ;;  %vm161_vm12 = vcmp.eq.f32.partialorder %v109_v43, 0.0 }
  0xe9   :  { %v767_v41 = vpop.eup %766 }
  0xea   :  { %v769_v44 = vpop.eup %768  ;;  %v111_v45 = vmul.f32 %v767_v41, %v90_v36 }
  0xeb   :  { %v131_v47 = vmul.f32 %v769_v44, %v98_v37 }
  0xec   :  { %v113_v48 = vsel %vm112_vm1, %v90_v36, %v111_v45 }
  0xed   :  { %v771_v49 = vpop.eup %770  ;;  %v116_v50 = vsel %vm114_vm2, %v115_v42, %v113_v48  ;;  %v133_v51 = vsel %vm132_vm3, %v98_v37, %v131_v47  ;;  %v672_v37 = vld [vmem:[%s1254_s4] ss:$0 sm:$0xff] }
  0xee   :  { %v124_v53 = vmax.f32 %v116_v50, 1e-12  ;;  %v136_v54 = vsel %vm134_vm4, %v135_v46, %v133_v51  ;;  %v118_v55 = vmul.f32 %v771_v49, %v93_v38  ;;  %v773_v57 = vpop.eup %772 }
  0xef   :  { %v144_v56 = vmax.f32 %v136_v54, 1e-12  ;;  %v138_v62 = vmul.f32 %v773_v57, %v101_v39 }
  0xf0   :  { %778 = vrcp.f32 %v124_v53  ;;  %v120_v58 = vsel %vm119_vm5, %v93_v38, %v118_v55  ;;  %v680_v55 = vld [vmem:[%s1254_s4 + $0x2] ss:$0 sm:$0xff] }
  0xf1   :  { %v775_v60 = vpop.eup %774  ;;  %780 = vrcp.f32 %v144_v56  ;;  %v123_v61 = vsel %vm121_vm6, %v122_v52, %v120_v58  ;;  %v140_v2 = vsel %vm139_vm7, %v101_v39, %v138_v62 }
  0xf2   :  { %v125_v0 = vmax.f32 %v123_v61, 1e-12  ;;  %v151_v1 = vmul.f32 %v775_v60, %v106_v40  ;;  %v777_v3 = vpop.eup %776  ;;  %v143_v4 = vsel %vm141_vm8, %v142_v59, %v140_v2  ;;  %v566_v2 = vmul.f32 %v1092_v22, %v1081_v14 }
  0xf3   :  { %v145_v7 = vmax.f32 %v143_v4, 1e-12  ;;  %v158_v9 = vmul.f32 %v777_v3, %v109_v43  ;;  %v599_v22 = vmul.f32 %v1095_v26, %v1075_v11 }
  0xf4   :  { %782 = vrcp.f32 %v125_v0  ;;  %v153_v5 = vsel %vm152_vm9, %v106_v40, %v151_v1  ;;  %v676_v40 = vld [vmem:[%s1254_s4 + $0x1] ss:$0 sm:$0xff]  ;;  %s963_s4 = smov [#allocation11]  }
  0xf5   :  { %v156_v8 = vsel %vm154_vm10, %v155_v63, %v153_v5  ;;  %784 = vrcp.f32 %v145_v7  ;;  %v160_v12 = vsel %vm159_vm11, %v109_v43, %v158_v9  ;;  %v570_v7 = vsel %vm87_vm0, %v566_v2, 0.0  ;;  %s655_s27 = sshll.u32 %s963_s4, 4  ;;  %s656_s27 = int_to_ptr.vmem [resolvable:$true] %s655_s27 }
  0xf6   :  { %v164_v10 = vmax.f32 %v156_v8, 1e-12  ;;  %v163_v15 = vsel %vm161_vm12, %v162_v6, %v160_v12  ;;  %v962_v12 = vmov 0.0   ;;  %s902_s28 = scalar_lea.vmem %s656_s27, 16  ;;  %s906_s29 = scalar_lea.vmem %s656_s27, 32 }
  0xf7   :  { %v165_v16 = vmax.f32 %v163_v15, 1e-12  ;;  %551 = vst.msk [vmem:[#allocation11] sm:$0x1] %vm550_vm13, %v962_v12  ;;  %p903_p4 = scmp.ne.s32.totalorder %s656_s27, %s902_s28  ;;  %p907_p5 = scmp.lt.s32.totalorder %s656_s27, %s656_s27 }
  0xf8   :  { %786 = vrcp.f32 %v164_v10  ;;  %v601_v10 = vsel %vm87_vm0, %v599_v22, 0.0  ;;  %p908_p6 = scmp.lt.s32.totalorder %s906_s29, %s902_s28 }
  0xf9   :  { %788 = vrcp.f32 %v165_v16 }
  0xfa   :  { %v1118_v17 = vpop.eup %778  ;;  %p909_p7 = por %p908_p6, %p907_p5 }
  0xfb   :  { %v1120_v18 = vpop.eup %780  ;;  %v563_v19 = vmul.f32 %v1118_v17, %v116_v50 }
  0xfc   :  { %v577_v20 = vmul.f32 %v1120_v18, %v136_v54  ;;  %p910_p8 = pnand %p909_p7, %p903_p4 }
  0xfe   :  { %v1124_v21 = vpop.eup %782  ;;  %v1126_v23 = vmul.f32 %v577_v20, %v563_v19 }
  0xff   :  { %v564_v24 = vmul.f32 %v1124_v21, %v123_v61  ;;  %v1129_v25 = vpop.eup %784 }
 0x100   :  { %v578_v28 = vmul.f32 %v1129_v25, %v143_v4  ;;  %v565_v4 = vmul.f32 %v1079_v13, %v1075_v11 }
 0x102   :  { %v1131_v27 = vpop.eup %786  ;;  %v1135_v30 = vmul.f32 %v578_v28, %v564_v24  ;;  %v567_v9 = vsel %vm87_vm0, %v565_v4, 0.0 }
 0x103   :  { %v611_v29 = vmul.f32 %v1131_v27, %v156_v8  ;;  %v1137_v32 = vpop.eup %788  ;;  %v600_v8 = vmul.f32 %v1102_v31, %v1081_v14  ;;  %v581_v31 = vmax.f32 %v1126_v23, 1e-06 }
 0x104   :  { %v612_v34 = vmul.f32 %v1137_v32, %v163_v15  ;;  %v582_v14 = vmax.f32 %v1135_v30, 1e-06 }
 0x105   :  { %v1139_v33 = vmul.f32 %v611_v29, %v563_v19  ;;  %v604_v13 = vsel %vm87_vm0, %v600_v8, 0.0 }
 0x106   :  { %v1142_v35 = vmul.f32 %v612_v34, %v564_v24  ;;  %790 = vrcp.f32 %v582_v14 }
 0x107   :  { %792 = vrcp.f32 %v581_v31  ;;  %v615_v29 = vmax.f32 %v1139_v33, 1e-06 }
 0x108   :  { %v616_v24 = vmax.f32 %v1142_v35, 1e-06 }
 0x10a   :  { %794 = vrcp.f32 %v616_v24 }
 0x10b   :  { %796 = vrcp.f32 %v615_v29 }
 0x129   :  { %v709_v36 = vpop.f32.mrb[0].mxu0  ;;  %v720_v39 = vpop.f32.mrb[0].mxu1 }
 0x12a   :  { %v256_v38 = vmul.f32 %v1124_v21, %v709_v36  ;;  %v246_v41 = vpop.f32.mrb[1].mxu0  ;;  %v363_v42 = vmul.f32 %v1129_v25, %v720_v39  ;;  %v353_v44 = vpop.f32.mrb[1].mxu1 }
 0x12b   :  { %v255_v43 = vmul.f32 %v1118_v17, %v246_v41  ;;  %v362_v46 = vmul.f32 %v1120_v18, %v353_v44 }
 0x12c   :  { %v1153_v45 = vadd.f32 %v672_v37, %v256_v38  ;;  %v1156_v47 = vadd.f32 %v676_v40, %v363_v42 }
 0x12d   :  { %v1158_v48 = vadd.f32 %v672_v37, %v255_v43  ;;  %v1160_v49 = vadd.f32 %v676_v40, %v362_v46 }
 0x12e   :  { %v267_v50 = vmul.f32 %v1153_v45, %v1153_v45  ;;  %v375_v53 = vmul.f32 %v1156_v47, %v1153_v45 }
 0x12f   :  { %v266_v51 = vmul.f32 %v1158_v48, %v1158_v48  ;;  %v374_v57 = vmul.f32 %v1160_v49, %v1158_v48 }
 0x130   :  { %v271_v52 = vsel %vm87_vm0, %v267_v50, 0.0  ;;  %v379_v62 = vsel %vm87_vm0, %v375_v53, 0.0 }
 0x131   :  { %v731_v54 = vpop.f32.mrb[2].mxu0  ;;  %272 = vadd.xlane.f32.xlu1 %v271_v52  ;;  %v268_v56 = vsel %vm87_vm0, %v266_v51, 0.0  ;;  %v376_v0 = vsel %vm87_vm0, %v374_v57, 0.0 }
 0x132   :  { %v471_v58 = vmul.f32 %v1137_v32, %v731_v54  ;;  %v461_v59 = vpop.f32.mrb[3].mxu0  ;;  %269 = vadd.xlane.f32.xlu0 %v268_v56 }
 0x133   :  { %v470_v60 = vmul.f32 %v1131_v27, %v461_v59 }
 0x134   :  { %v1177_v61 = vadd.f32 %v680_v55, %v471_v58  ;;  %v791_v58 = vpop.eup %790 }
 0x135   :  { %v1180_v63 = vadd.f32 %v680_v55, %v470_v60  ;;  %380 = vadd.xlane.f32.xlu1 %v379_v62 }
 0x136   :  { %377 = vadd.xlane.f32.xlu0 %v376_v0  ;;  %v483_v1 = vmul.f32 %v1177_v61, %v1153_v45  ;;  %v793_v0 = vpop.eup %792 }
 0x137   :  { %v482_v3 = vmul.f32 %v1180_v63, %v1158_v48  ;;  %v795_v8 = vpop.eup %794 }
 0x138   :  { %v487_v5 = vsel %vm87_vm0, %v483_v1, 0.0  ;;  %v797_v22 = vpop.eup %796 }
 0x139   :  { %488 = vadd.xlane.f32.xlu1 %v487_v5  ;;  %v484_v6 = vsel %vm87_vm0, %v482_v3, 0.0 }
 0x13a   :  { %485 = vadd.xlane.f32.xlu0 %v484_v6 }
 0x13d   :  { %571 = vadd.xlane.f32.xlu1 %v570_v7 }
 0x13e   :  { %568 = vadd.xlane.f32.xlu0 %v567_v9 }
 0x141   :  { %605 = vadd.xlane.f32.xlu1 %v604_v13 }
 0x142   :  { %602 = vadd.xlane.f32.xlu0 %v601_v10 }
 0x1be   :  { %v273_v15 = vpop.xlane.xlu1 %272 }
 0x1bf   :  { %v270_v16 = vpop.xlane.xlu0 %269  ;;  %v275_v28 = vmul.f32 0.17677669, %v273_v15 }
 0x1c0   :  { %v274_v34 = vmul.f32 0.17677669, %v270_v16 }
 0x1c2   :  { %v381_v19 = vpop.xlane.xlu1 %380 }
 0x1c3   :  { %v383_v11 = vmul.f32 0.17677669, %v381_v19  ;;  %v378_v26 = vpop.xlane.xlu0 %377 }
 0x1c4   :  { %v382_v20 = vmul.f32 0.17677669, %v378_v26 }
 0x1c5   :  { %v493_v37 = vmax.f32 %v275_v28, %v383_v11 }
 0x1c6   :  { %v489_v36 = vpop.xlane.xlu1 %488  ;;  %v492_v40 = vmax.f32 %v274_v34, %v382_v20 }
 0x1c7   :  { %v491_v38 = vmul.f32 0.17677669, %v489_v36  ;;  %v486_v39 = vpop.xlane.xlu0 %485 }
 0x1c8   :  { %v490_v30 = vmul.f32 0.17677669, %v486_v39 }
 0x1c9   :  { %v495_v23 = vmax.f32 %v493_v37, %v491_v38 }
 0x1ca   :  { %v494_v41 = vmax.f32 %v492_v40, %v490_v30  ;;  %v572_v42 = vpop.xlane.xlu1 %571 }
 0x1cb   :  { %v497_v43 = vsub.f32 %v275_v28, %v495_v23  ;;  %v503_v44 = vsub.f32 %v383_v11, %v495_v23  ;;  %v509_v46 = vsub.f32 %v491_v38, %v495_v23  ;;  %v574_v35 = vmul.f32 %v1124_v21, %v572_v42  ;;  %v569_v50 = vpop.xlane.xlu0 %568 }
 0x1cc   :  { %v496_v51 = vsub.f32 %v274_v34, %v494_v41  ;;  %v502_v33 = vsub.f32 %v382_v20, %v494_v41  ;;  %v508_v52 = vsub.f32 %v490_v30, %v494_v41  ;;  %v573_v53 = vmul.f32 %v1118_v17, %v569_v50 }
 0x1cd   :  { %v500_v54 = vmul.f32 1.442695, %v497_v43  ;;  %v506_v55 = vmul.f32 1.442695, %v503_v44  ;;  %v512_v56 = vmul.f32 1.442695, %v509_v46  ;;  %v576_v57 = vmul.f32 %v1129_v25, %v574_v35 }
 0x1ce   :  { %v498_v59 = vmul.f32 1.442695, %v496_v51  ;;  %v575_v60 = vmul.f32 %v1120_v18, %v573_v53  ;;  %v606_v62 = vpop.xlane.xlu1 %605  ;;  %v504_v1 = vmul.f32 1.442695, %v502_v33  ;;  %v510_v7 = vmul.f32 1.442695, %v508_v52 }
 0x1cf   :  { %798 = vpow2.f32 %v500_v54  ;;  %v586_v2 = vmul.f32 %v791_v58, %v576_v57  ;;  %v608_v3 = vmul.f32 %v1124_v21, %v606_v62  ;;  %v603_v4 = vpop.xlane.xlu0 %602  ;;  %v633_v44 = vld [vmem:[#allocation11] sm:$0x1] }
 0x1d0   :  { %800 = vpow2.f32 %v506_v55  ;;  %v584_v5 = vmul.f32 %v793_v0, %v575_v60  ;;  %v607_v6 = vmul.f32 %v1118_v17, %v603_v4  ;;  %v561_v17 = vlaneseq }
 0x1d1   :  { %802 = vpow2.f32 %v512_v56  ;;  %v610_v25 = vmul.f32 %v1137_v32, %v608_v3 }
 0x1d2   :  { %804 = vpow2.f32 %v498_v59  ;;  %v589_v9 = vadd.f32 %v586_v2, %v584_v5  ;;  %v609_v18 = vmul.f32 %v1131_v27, %v607_v6  ;;  %v562_v29 = vand.u32 127, %v561_v17 }
 0x1d3   :  { %806 = vpow2.f32 %v504_v1  ;;  %v620_v13 = vmul.f32 %v795_v8, %v610_v25 }
 0x1d4   :  { %v590_v10 = vrot.slane %v589_v9, 4  ;;  %v618_v12 = vmul.f32 %v797_v22, %v609_v18  ;;  %808 = vpow2.f32 %v510_v7  ;;  %vm596_vm14 = vcmp.eq.s32.totalorder %v562_v29, 1 }
 0x1d5   :  { %vm630_vm15 = vcmp.eq.s32.totalorder %v562_v29, 2 }
 0x1d6   :  { %v591_v21 = vadd.f32 %v590_v10, %v589_v9  ;;  %v623_v15 = vadd.f32 %v620_v13, %v618_v12 }
 0x1d8   :  { %v592_v16 = vrot.slane %v591_v21, 2  ;;  %v624_v14 = vrot.slane %v623_v15, 4 }
 0x1d9   :  { %v799_v31 = vpop.eup %798 }
 0x1da   :  { %v801_v19 = vpop.eup %800  ;;  %v593_v11 = vadd.f32 %v592_v16, %v591_v21  ;;  %v625_v32 = vadd.f32 %v624_v14, %v623_v15 }
 0x1db   :  { %v803_v26 = vpop.eup %802  ;;  %v515_v20 = vadd.f32 %v801_v19, %v799_v31 }
 0x1dc   :  { %v805_v24 = vpop.eup %804  ;;  %v594_v28 = vrot.slane %v593_v11, 1  ;;  %v626_v27 = vrot.slane %v625_v32, 2 }
 0x1dd   :  { %v807_v34 = vpop.eup %806  ;;  %v517_v36 = vadd.f32 %v803_v26, %v515_v20 }
 0x1de   :  { %v514_v37 = vadd.f32 %v807_v34, %v805_v24  ;;  %v627_v38 = vadd.f32 %v626_v27, %v625_v32  ;;  %v809_v39 = vpop.eup %808  ;;  %v595_v40 = vadd.f32 %v594_v28, %v593_v11 }
 0x1df   :  { %810 = vrcp.f32 %v517_v36 }
 0x1e0   :  { %v516_v30 = vadd.f32 %v809_v39, %v514_v37  ;;  %v628_v23 = vrot.slane %v627_v38, 1  ;;  %v598_v42 = vsel %vm596_vm14, %v595_v40, 0.0 }
 0x1e2   :  { %812 = vrcp.f32 %v516_v30  ;;  %v629_v41 = vadd.f32 %v628_v23, %v627_v38 }
 0x1e4   :  { %v631_v43 = vadd.f32 %v629_v41, %v598_v42 }
 0x1e6   :  { %v632_v46 = vsel %vm630_vm15, %v631_v43, %v598_v42 }
 0x1e7   :  { %v634_v35 = vadd.f32 %v633_v44, %v632_v46 }
 0x1e9   :  { %v811_v50 = vpop.eup %810  ;;  %636 = vst.msk [vmem:[#allocation11] sm:$0x1] %vm550_vm13, %v634_v35 }
 0x1ea   :  { %v521_v51 = vmul.f32 %v811_v50, %v799_v31  ;;  %v525_v33 = vmul.f32 %v811_v50, %v801_v19  ;;  %v531_v52 = vmul.f32 %v811_v50, %v803_v26 }
 0x1eb   :  { %913 = shalt.err (!%p910_p8)
}
 0x1ec   :  { %s914_s8 = scalar_lea.hbm %s1256_s6, 16 }
 0x1ed   :  { %p915_p9 = scmp.ne.s32.totalorder %s1256_s6, %s914_s8  ;;  %p918_p10 = scmp.lt.u32.totalorder %s914_s8, %s1256_s6 }
 0x1ef   :  { %p920_p11 = pnand %p918_p10, %p915_p9 }
 0x1f1   :  { %923 = shalt.err (!%p920_p11)
}
 0x1f2   :  { %658 = dma.vmem_to_hbm [thread:$0]  %s656_s27, 16, %s1256_s6, [#allocation12]   ;;  %v813_v53 = vpop.eup %812  ;;  %v523_v54 = vmul.f32 %v521_v51, %v1153_v45  ;;  %v527_v55 = vmul.f32 %v525_v33, %v1156_v47  ;;  %v533_v60 = vmul.f32 %v531_v52, %v1177_v61 }
 0x1f3   :  { %v520_v56 = vmul.f32 %v813_v53, %v805_v24  ;;  %v524_v57 = vmul.f32 %v813_v53, %v807_v34  ;;  %v530_v58 = vmul.f32 %v813_v53, %v809_v39  ;;  %s964_s6 = smov 96   ;;  %s965_s15 = smov [#allocation10]  }
 0x1f4   :  { %v529_v59 = vadd.f32 %v527_v55, %v523_v54  ;;  %s642_s16 = sshll.u32 %s965_s15, 4  ;;  %s643_s16 = int_to_ptr.vmem [resolvable:$true] %s642_s16 }
 0x1f5   :  { %v522_v62 = vmul.f32 %v520_v56, %v1158_v48  ;;  %v526_v0 = vmul.f32 %v524_v57, %v1160_v49  ;;  %v532_v3 = vmul.f32 %v530_v58, %v1180_v63  ;;  %s924_s17 = scalar_lea.vmem %s643_s16, 256  ;;  %p929_p13 = scmp.lt.s32.totalorder %s643_s16, %s643_s16 }
 0x1f6   :  { %v535_v1 = vadd.f32 %v533_v60, %v529_v59  ;;  %p925_p12 = scmp.ne.s32.totalorder %s643_s16, %s924_s17  ;;  %p930_p0 = scmp.lt.s32.totalorder %s924_s17, %s924_s17 }
 0x1f7   :  { %v528_v2 = vadd.f32 %v526_v0, %v522_v62 }
 0x1f8   :  { %540 = vrot.lane.b32.xlu1 %v535_v1, %s964_s6  ;;  %p931_p1 = por %p930_p0, %p929_p13 }
 0x1f9   :  { %v534_v4 = vadd.f32 %v532_v3, %v528_v2 }
 0x1fa   :  { %p932_p2 = pnand %p931_p1, %p925_p12 }
 0x1fb   :  { %538 = vrot.lane.b32.xlu0 %v534_v4, %s964_s6 }
 0x26a   :  { %v541_v45 = vpop.permute.xlu1 %540 }
 0x26b   :  { %545 = vst.msk [vmem:[#allocation10 + $0x8] sm:$0xff] %vm87_vm0, %v541_v45 }
 0x26d   :  { %v539_v47 = vpop.permute.xlu0 %538 }
 0x26e   :  { %544 = vst.msk [vmem:[#allocation10] sm:$0xff] %vm87_vm0, %v539_v47 }
 0x26f   :  { %935 = shalt.err (!%p932_p2)
}
 0x270   :  { %s936_s20 = scalar_lea.hbm %s1255_s5, 256 }
 0x271   :  { %p937_p3 = scmp.ne.s32.totalorder %s1255_s5, %s936_s20  ;;  %p940_p4 = scmp.lt.u32.totalorder %s936_s20, %s1255_s5 }
 0x273   :  { %p942_p5 = pnand %p940_p4, %p937_p3 }
 0x275   :  { %945 = shalt.err (!%p942_p5)
}
 0x276   :  { %648 = dma.vmem_to_hbm [thread:$0]  %s643_s16, 256, %s1255_s5, [#allocation4], %s958_s9, %s958_s9, %s959_s10  }
 0x277   :  { %952 = dma.done.wait [#allocation4], 256  }
 0x278   :  { %953 = vsyncadd [#allocation4], 4294967040 }
 0x279   :  { %954 = dma.done.wait [#allocation12], 16  }
 0x27a   :  { %955 = vsyncadd [#allocation12], 4294967280 }
 0x27b   :  { %665 = vsyncpa [#allocation3], 1 }
 0x27c   :  { %666 = vsyncpa [#allocation6], 1 }
 0x27d   :  { %667 = vsyncpa [#allocation9], 1 }
 0x27e   :  { %668 = vsyncpa [#allocation4], 1 }
 0x27f   :  { %669 = vsyncpa [#allocation12], 1 }

</bundles_post_ra>
